<compile_context>
chip_gen: v7x
topology: tpu7x:2x2x1
jax: 0.10.0
libtpu: 0.0.40
codegen_flags: <defaults>
</compile_context>

<pallas_src>
import numpy as np
import jax
import jax.numpy as jnp
from jax import lax
from jax.experimental import pallas as pl
from jax.experimental.pallas import tpu as pltpu

# ----------------------------- cfg (standard Faster R-CNN defaults) ----------
RPN_NEGATIVE_OVERLAP = 0.3
RPN_POSITIVE_OVERLAP = 0.7
RPN_CLOBBER_POSITIVES = False
RPN_FG_FRACTION = 0.5
RPN_BBOX_INSIDE_WEIGHT = 1.0
RPN_POSITIVE_WEIGHT = -1.0
ALLOWED_BORDER = 0

LANE = 128
MAX_TILE_N = 8192          # anchors per grid step (multiple of 128); sweep 4096/8192/16384
NEG_BIG = -1e30            # finite "minus infinity" for masked maxima

# rows of the packed (8, N) IoU slab
_I_X1, _I_Y1, _I_X2, _I_Y2 = 0, 1, 2, 3
_I_AREA, _I_ZERO, _I_INSIDE = 4, 5, 6
IOU_ROWS = 8
# rows of the packed (8, N) regression slab
_G_CX, _G_CY, _G_LOGW, _G_LOGH, _G_INVW, _G_INVH, _G_INSIDE = 0, 1, 2, 3, 4, 5, 6
REG_ROWS = 8


# ----------------------------- anchor generation (numpy, trace-time) ---------
def _whctrs(anchor):
    w = anchor[2] - anchor[0] + 1
    h = anchor[3] - anchor[1] + 1
    x_ctr = anchor[0] + 0.5 * (w - 1)
    y_ctr = anchor[1] + 0.5 * (h - 1)
    return w, h, x_ctr, y_ctr


def _mkanchors(ws, hs, x_ctr, y_ctr):
    ws = ws[:, np.newaxis]
    hs = hs[:, np.newaxis]
    return np.hstack((x_ctr - 0.5 * (ws - 1), y_ctr - 0.5 * (hs - 1),
                      x_ctr + 0.5 * (ws - 1), y_ctr + 0.5 * (hs - 1)))


def _ratio_enum(anchor, ratios):
    w, h, x_ctr, y_ctr = _whctrs(anchor)
    size = w * h
    size_ratios = size / ratios
    ws = np.round(np.sqrt(size_ratios))
    hs = np.round(ws * ratios)
    return _mkanchors(ws, hs, x_ctr, y_ctr)


def _scale_enum(anchor, scales):
    w, h, x_ctr, y_ctr = _whctrs(anchor)
    ws = w * scales
    hs = h * scales
    return _mkanchors(ws, hs, x_ctr, y_ctr)


def generate_anchors(base_size=16, ratios=(0.5, 1, 2), scales=(8, 16, 32)):
    base_anchor = np.array([1, 1, base_size, base_size], dtype=np.float64) - 1
    ratio_anchors = _ratio_enum(base_anchor, np.array(ratios, dtype=np.float64))
    anchors = np.vstack([_scale_enum(ratio_anchors[i, :], np.array(scales, dtype=np.float64))
                         for i in range(ratio_anchors.shape[0])])
    return anchors.astype(np.float32)


# ----------------------------- shared in-kernel helpers ----------------------
def _pairwise_overlaps(iou_ref, gt):
    """iou_ref: (8, TN) packed anchor IoU rows; gt: (G, 5).  Returns IoU (G, TN)."""
    ax1 = iou_ref[_I_X1:_I_X1 + 1, :]
    ay1 = iou_ref[_I_Y1:_I_Y1 + 1, :]
    ax2 = iou_ref[_I_X2:_I_X2 + 1, :]
    ay2 = iou_ref[_I_Y2:_I_Y2 + 1, :]
    a_area = iou_ref[_I_AREA:_I_AREA + 1, :]
    a_zero = iou_ref[_I_ZERO:_I_ZERO + 1, :]

    gx1 = gt[:, 0:1]
    gy1 = gt[:, 1:2]
    gx2 = gt[:, 2:3]
    gy2 = gt[:, 3:4]
    gw = gx2 - gx1 + 1.0
    gh = gy2 - gy1 + 1.0
    gt_area = gw * gh                               # (G, 1)
    gt_zero = (gw == 1.0) & (gh == 1.0)             # (G, 1)

    iw = jnp.maximum(jnp.minimum(ax2, gx2) - jnp.maximum(ax1, gx1) + 1.0, 0.0)
    ih = jnp.maximum(jnp.minimum(ay2, gy2) - jnp.maximum(ay1, gy1) + 1.0, 0.0)
    inter = iw * ih                                 # (G, TN)
    ua = a_area + gt_area - inter                   # (G, TN), always >= 1
    # divide -> EUP approx reciprocal (VALU is the binding unit).
    # TODO(synk): approx reciprocal -> IoU is EUP-approx accurate; add one
    # Newton step or exact divide if bit-parity with the torch reference matters.
    ov = inter * pl.reciprocal(ua, approx=True)
    ov = jnp.where(gt_zero, 0.0, ov)                # zero (padded) gt boxes -> 0
    ov = jnp.where(a_zero > 0.0, -1.0, ov)          # degenerate anchors -> -1
    return ov


def _assign_body(ov, gt_max_raw, reg_ref, gt_t, tril, labels_ref, targets_ref):
    """Labels + bbox regression targets from a precomputed ov (G, TN)."""
    inside = reg_ref[_G_INSIDE:_G_INSIDE + 1, :] > 0.0     # (1, TN) bool

    # reference: gt_max_overlaps[gt_max_overlaps == 0] = 1e-5
    gt_max = jnp.where(gt_max_raw == 0.0, 1e-5, gt_max_raw)     # (G, 1)

    # per-anchor max over gt boxes
    max_ov = jnp.max(ov, axis=0, keepdims=True)             # (1, TN)

    # forced positives: anchors matching the per-gt max over inside anchors
    keep = jnp.sum((ov == gt_max).astype(jnp.float32), axis=0, keepdims=True)

    labels = jnp.full_like(max_ov, -1.0)
    if not RPN_CLOBBER_POSITIVES:
        labels = jnp.where(max_ov < RPN_NEGATIVE_OVERLAP, 0.0, labels)
    labels = jnp.where(keep > 0.0, 1.0, labels)
    labels = jnp.where(max_ov >= RPN_POSITIVE_OVERLAP, 1.0, labels)
    if RPN_CLOBBER_POSITIVES:
        labels = jnp.where(max_ov < RPN_NEGATIVE_OVERLAP, 0.0, labels)
    # store labels BEFORE the tril/gather matmuls so keep/labels die early
    labels_ref[0, :, :] = jnp.where(inside, labels, -1.0)   # "unmap" fill = -1

    # one-hot "first max over gt" (min-index tie-break), no iota/argmax:
    # prefix[i, n] = #maxima among rows j < i  (strictly-lower-tri MXU matmul)
    is_max = (ov == max_ov).astype(jnp.float32)              # ov dies after this
    prefix = jnp.dot(tril, is_max, preferred_element_type=jnp.float32)
    sel = jnp.where((is_max > 0.0) & (prefix < 0.5), 1.0, 0.0)   # (G, TN) one-hot

    # gather matched gt coords with a single (4,G)x(G,TN) MXU matmul
    g = jnp.dot(gt_t, sel, preferred_element_type=jnp.float32)   # (4, TN)
    g_w = g[2:3, :] - g[0:1, :] + 1.0
    g_h = g[3:4, :] - g[1:2, :] + 1.0
    g_cx = g[0:1, :] + 0.5 * g_w
    g_cy = g[1:2, :] + 0.5 * g_h

    dx = (g_cx - reg_ref[_G_CX:_G_CX + 1, :]) * reg_ref[_G_INVW:_G_INVW + 1, :]
    dy = (g_cy - reg_ref[_G_CY:_G_CY + 1, :]) * reg_ref[_G_INVH:_G_INVH + 1, :]
    dw = jnp.log(g_w) - reg_ref[_G_LOGW:_G_LOGW + 1, :]          # log(g_w/ex_w)
    dh = jnp.log(g_h) - reg_ref[_G_LOGH:_G_LOGH + 1, :]

    tgt = jnp.concatenate([dx, dy, dw, dh], axis=0)              # (4, TN)
    # single (4, TN) store; "unmap" fill = 0 for outside anchors
    targets_ref[0, :, :] = jnp.where(inside, tgt, 0.0)


# ----------------------------- fused kernel (single N-tile, grid=(B,)) -------
def _fused_kernel(iou_ref, reg_ref, gt_ref, gt_t_ref, tril_ref,
                  labels_ref, targets_ref):
    gt = gt_ref[0]                                           # (G, 5)
    ov = _pairwise_overlaps(iou_ref, gt)                     # (G, TN) — computed ONCE
    inside = iou_ref[_I_INSIDE:_I_INSIDE + 1, :]             # (1, TN)
    # per-gt max over inside anchors, kept entirely in-register
    gt_max_raw = jnp.max(jnp.where(inside > 0.0, ov, NEG_BIG), axis=1, keepdims=True)
    _assign_body(ov, gt_max_raw, reg_ref, gt_t_ref[0], tril_ref[...],
                 labels_ref, targets_ref)


# ----------------------------- tiled fallback: pass 1 (per-gt max) -----------
def _gt_max_kernel(iou_ref, gt_ref, gtmax_ref):
    @pl.when(pl.program_id(1) == 0)
    def _():
        gtmax_ref[...] = jnp.full(gtmax_ref.shape, NEG_BIG, dtype=gtmax_ref.dtype)

    gt = gt_ref[0]                                           # (G, 5)
    ov = _pairwise_overlaps(iou_ref, gt)                     # (G, TN)
    inside = iou_ref[_I_INSIDE:_I_INSIDE + 1, :]
    tile_max = jnp.max(jnp.where(inside > 0.0, ov, NEG_BIG), axis=1, keepdims=True)
    gtmax_ref[0] = jnp.maximum(gtmax_ref[0], tile_max)


# ----------------------------- tiled fallback: pass 2 (assignment) -----------
def _assign_kernel(iou_ref, reg_ref, gt_ref, gt_t_ref, tril_ref, gtmax_ref,
                   labels_ref, targets_ref):
    gt = gt_ref[0]                                           # (G, 5)
    ov = _pairwise_overlaps(iou_ref, gt)                     # bit-identical to pass 1
    _assign_body(ov, gtmax_ref[0], reg_ref, gt_t_ref[0], tril_ref[...],
                 labels_ref, targets_ref)


# ----------------------------- pallas_call drivers ----------------------------
def _vmem_limit_bytes():
    """Generation-aware scoped-VMEM limit: <=48 MiB on v7x, up to 96 MiB on v5e/v6e."""
    try:
        cap = int(pltpu.get_tpu_info().vmem_capacity_bytes)
    except Exception:
        cap = 64 * 1024 * 1024     # conservative (v7x per-TC VMEM)
    return max(32 * 1024 * 1024, min(cap * 3 // 4, 96 * 1024 * 1024))


def _choose_tiling(n):
    n_pad = ((n + LANE - 1) // LANE) * LANE
    if n_pad <= MAX_TILE_N:
        return n_pad, n_pad, 1
    tn = MAX_TILE_N
    n_pad = ((n + tn - 1) // tn) * tn
    return n_pad, tn, n_pad // tn


def _run_fused(iou_pack, reg_pack, gt_boxes, gt_t, tril, n_pad, vmem_limit):
    B, G, _ = gt_boxes.shape
    return pl.pallas_call(
        _fused_kernel,
        out_shape=(jax.ShapeDtypeStruct((B, 1, n_pad), jnp.float32),
                   jax.ShapeDtypeStruct((B, 4, n_pad), jnp.float32)),
        grid_spec=pltpu.PrefetchScalarGridSpec(
            num_scalar_prefetch=0,
            grid=(B,),
            in_specs=[
                pl.BlockSpec((IOU_ROWS, n_pad), lambda b: (0, 0)),
                pl.BlockSpec((REG_ROWS, n_pad), lambda b: (0, 0)),
                pl.BlockSpec((1, G, 5), lambda b: (b, 0, 0)),
                pl.BlockSpec((1, 4, G), lambda b: (b, 0, 0)),
                pl.BlockSpec((G, G), lambda b: (0, 0)),
            ],
            out_specs=[
                pl.BlockSpec((1, 1, n_pad), lambda b: (b, 0, 0)),
                pl.BlockSpec((1, 4, n_pad), lambda b: (b, 0, 0)),
            ],
        ),
        compiler_params=pltpu.CompilerParams(
            dimension_semantics=("parallel",),
            vmem_limit_bytes=vmem_limit),
    )(iou_pack, reg_pack, gt_boxes, gt_t, tril)


def _run_two_pass(iou_pack, reg_pack, gt_boxes, gt_t, tril, tn, num_tiles, vmem_limit):
    B, G, _ = gt_boxes.shape
    n_pad = iou_pack.shape[1]

    # pass 1: per-gt max over inside anchors (reduction over the N-tile axis);
    # only binds the 8-row IoU slab (half the HBM traffic of a 16-row slab)
    gt_max = pl.pallas_call(
        _gt_max_kernel,
        out_shape=jax.ShapeDtypeStruct((B, G, 1), jnp.float32),
        grid_spec=pltpu.PrefetchScalarGridSpec(
            num_scalar_prefetch=0,
            grid=(B, num_tiles),
            in_specs=[
                pl.BlockSpec((IOU_ROWS, tn), lambda b, t: (0, t)),
                pl.BlockSpec((1, G, 5), lambda b, t: (b, 0, 0)),
            ],
            out_specs=pl.BlockSpec((1, G, 1), lambda b, t: (b, 0, 0)),
        ),
        compiler_params=pltpu.CompilerParams(
            dimension_semantics=("parallel", "arbitrary"),
            vmem_limit_bytes=vmem_limit),
    )(iou_pack, gt_boxes)

    # pass 2: labels + bbox targets; grid reordered to (num_tiles, B) so the
    # anchor slabs (index depends only on t) stay resident across the batch axis.
    labels3, targets3 = pl.pallas_call(
        _assign_kernel,
        out_shape=(jax.ShapeDtypeStruct((B, 1, n_pad), jnp.float32),
                   jax.ShapeDtypeStruct((B, 4, n_pad), jnp.float32)),
        grid_spec=pltpu.PrefetchScalarGridSpec(
            num_scalar_prefetch=0,
            grid=(num_tiles, B),
            in_specs=[
                pl.BlockSpec((IOU_ROWS, tn), lambda t, b: (0, t)),
                pl.BlockSpec((REG_ROWS, tn), lambda t, b: (0, t)),
                pl.BlockSpec((1, G, 5), lambda t, b: (b, 0, 0)),
                pl.BlockSpec((1, 4, G), lambda t, b: (b, 0, 0)),
                pl.BlockSpec((G, G), lambda t, b: (0, 0)),
                pl.BlockSpec((1, G, 1), lambda t, b: (b, 0, 0)),
            ],
            out_specs=[
                pl.BlockSpec((1, 1, tn), lambda t, b: (b, 0, t)),
                pl.BlockSpec((1, 4, tn), lambda t, b: (b, 0, t)),
            ],
        ),
        compiler_params=pltpu.CompilerParams(
            dimension_semantics=("parallel", "parallel"),
            vmem_limit_bytes=vmem_limit),
    )(iou_pack, reg_pack, gt_boxes, gt_t, tril, gt_max)
    return labels3, targets3


# ----------------------------- module wrapper ---------------------------------
class AnchorTargetLayerPallas:
    def __init__(self, feat_stride, scales, ratios, rpn_batchsize):
        self._feat_stride = feat_stride
        self._anchors = generate_anchors(scales=np.array(scales, dtype=np.float64),
                                         ratios=np.array(ratios, dtype=np.float64))
        self._num_anchors = self._anchors.shape[0]
        self.rpn_batchsize = rpn_batchsize
        self._allowed_border = ALLOWED_BORDER

    def __call__(self, rpn_cls_score, gt_boxes, im_info, num_boxes, key=None):
        H, W = rpn_cls_score.shape[2], rpn_cls_score.shape[3]
        B, G = gt_boxes.shape[0], gt_boxes.shape[1]
        A = self._num_anchors
        N = H * W * A

        gt_boxes = gt_boxes.astype(jnp.float32)

        # --- all anchors on the feature grid (trace-time numpy) ---
        shift_x = np.arange(0, W) * self._feat_stride
        shift_y = np.arange(0, H) * self._feat_stride
        sx, sy = np.meshgrid(shift_x, shift_y)
        shifts = np.vstack((sx.ravel(), sy.ravel(), sx.ravel(), sy.ravel())).T.astype(np.float32)
        all_anchors = jnp.asarray(
            (self._anchors[None, :, :] + shifts[:, None, :]).reshape(N, 4))

        # --- pack anchor-invariant rows into two (8, N_pad) slabs ---
        ax1, ay1, ax2, ay2 = (all_anchors[:, i] for i in range(4))
        # NOTE: like the reference, the border test uses im_info[0] for every batch item.
        inside = ((ax1 >= -self._allowed_border) &
                  (ay1 >= -self._allowed_border) &
                  (ax2 < im_info[0, 1] + self._allowed_border) &
                  (ay2 < im_info[0, 0] + self._allowed_border)).astype(jnp.float32)
        aw = ax2 - ax1 + 1.0
        ah = ay2 - ay1 + 1.0
        a_area = aw * ah
        a_zero = ((aw == 1.0) & (ah == 1.0)).astype(jnp.float32)
        ex_cx = ax1 + 0.5 * aw
        ex_cy = ay1 + 0.5 * ah
        zero = jnp.zeros_like(ax1)

        iou_pack = jnp.stack([ax1, ay1, ax2, ay2, a_area, a_zero, inside, zero], axis=0)
        reg_pack = jnp.stack([ex_cx, ex_cy, jnp.log(aw), jnp.log(ah),
                              1.0 / aw, 1.0 / ah, inside, zero], axis=0)

        n_pad, tn, num_tiles = _choose_tiling(N)
        if n_pad != N:
            pad = ((0, 0), (0, n_pad - N))
            iou_pack = jnp.pad(iou_pack, pad)        # padded anchors: inside = 0
            reg_pack = jnp.pad(reg_pack, pad)

        gt_t = jnp.transpose(gt_boxes[:, :, :4], (0, 2, 1))   # (B, 4, G) for MXU gather
        tril = jnp.asarray(np.tril(np.ones((G, G), dtype=np.float32), k=-1))

        vmem_limit = _vmem_limit_bytes()

        # --- Pallas kernel(s): overlaps -> gt_max -> labels + bbox targets ---
        if num_tiles == 1:
            labels3, targets3 = _run_fused(iou_pack, reg_pack, gt_boxes, gt_t, tril,
                                           n_pad, vmem_limit)
        else:
            labels3, targets3 = _run_two_pass(iou_pack, reg_pack, gt_boxes, gt_t, tril,
                                              tn, num_tiles, vmem_limit)
        labels = labels3[:, 0, :N]                                  # (B, N)
        bbox_targets = jnp.transpose(targets3[:, :, :N], (0, 2, 1))  # (B, N, 4)

        # --- fg / bg subsampling (glue, wrapper-side) ---
        # TODO(synk): reference uses host-side np.random.permutation; here a random
        # subset of equal size is chosen via jax.random + lax.top_k threshold selection.
        if key is None:
            key = jax.random.PRNGKey(0)
        kf, kb = jax.random.split(key)

        num_fg = int(RPN_FG_FRACTION * self.rpn_batchsize)
        fg = labels == 1.0
        bg = labels == 0.0
        sum_fg = jnp.sum(fg, axis=1, keepdims=True)                 # (B, 1) int32
        sum_bg = jnp.sum(bg, axis=1, keepdims=True)

        # fg: keep the num_fg smallest random scores among fg anchors
        rand_fg = jax.random.uniform(kf, (B, N))
        score_fg = jnp.where(fg, rand_fg, jnp.inf)
        k_fg = max(1, min(num_fg, N))
        neg_top_fg, _ = lax.top_k(-score_fg, k_fg)                  # ascending scores, negated
        thr_fg = -neg_top_fg[:, k_fg - 1:k_fg]                      # num_fg-th smallest
        disable_fg = fg & (sum_fg > num_fg) & (score_fg > thr_fg)
        labels = jnp.where(disable_fg, -1.0, labels)

        # NOTE: the reference computes num_bg = RPN_BATCHSIZE - sum_fg[i] with
        # sum_fg taken BEFORE the fg subsampling; reproduced exactly here.
        num_bg = self.rpn_batchsize - sum_fg                        # (B, 1) int32
        rand_bg = jax.random.uniform(kb, (B, N))
        score_bg = jnp.where(bg, rand_bg, jnp.inf)
        k_bg = max(1, min(self.rpn_batchsize, N))
        neg_top_bg, _ = lax.top_k(-score_bg, k_bg)                  # (B, k_bg)
        sorted_bg_small = -neg_top_bg                               # k_bg smallest, ascending
        bg_idx = jnp.clip(num_bg - 1, 0, k_bg - 1)
        thr_bg = jnp.take_along_axis(sorted_bg_small, bg_idx, axis=1)
        disable_bg = bg & (sum_bg > num_bg) & (score_bg > thr_bg)
        labels = jnp.where(disable_bg, -1.0, labels)

        # --- weights (reference uses the LAST batch item for num_examples) ---
        bbox_inside_small = jnp.where(labels == 1.0, RPN_BBOX_INSIDE_WEIGHT, 0.0)   # (B, N)
        num_examples = jnp.sum((labels[B - 1] >= 0.0).astype(jnp.float32))
        # TODO(synk): only the RPN_POSITIVE_WEIGHT < 0 branch of the reference is implemented.
        pos_w = 1.0 / num_examples
        neg_w = 1.0 / num_examples
        bbox_outside_small = jnp.where(labels == 1.0, pos_w, 0.0)
        bbox_outside_small = jnp.where(labels == 0.0, neg_w, bbox_outside_small)

        # --- final NCHW outputs ---
        labels_out = labels.reshape(B, H, W, A).transpose(0, 3, 1, 2).reshape(B, 1, A * H, W)
        bbox_targets_out = bbox_targets.reshape(B, H, W, A * 4).transpose(0, 3, 1, 2)

        def _expand_weights(w):
            # transpose the small (B, A, H, W) map first, broadcast to 4 channels after
            w_ahw = w.reshape(B, H, W, A).transpose(0, 3, 1, 2)          # (B, A, H, W)
            return jnp.broadcast_to(w_ahw[:, :, None, :, :],
                                    (B, A, 4, H, W)).reshape(B, 4 * A, H, W)

        biw_out = _expand_weights(bbox_inside_small)
        bow_out = _expand_weights(bbox_outside_small)

        return [labels_out, bbox_targets_out, biw_out, bow_out]


# ----------------------------- demo ------------------------------------------
if __name__ == "__main__":
    key = jax.random.PRNGKey(0)

    B, H, W, G = 2, 8, 8, 5
    feat_stride = 8
    scales = [2, 4]
    ratios = [0.5, 1, 2]
    A = len(scales) * len(ratios)          # 6
    rpn_batchsize = 64
    img_h, img_w = 64.0, 64.0

    layer = AnchorTargetLayerPallas(feat_stride, scales, ratios, rpn_batchsize)

    k1, k2, k3, k4 = jax.random.split(key, 4)
    rpn_cls_score = jax.random.normal(k1, (B, 2 * A, H, W), dtype=jnp.float32)
    x1 = jax.random.uniform(k2, (B, G), minval=0.0, maxval=30.0)
    y1 = jax.random.uniform(k3, (B, G), minval=0.0, maxval=30.0)
    wh = jax.random.uniform(k4, (B, G, 2), minval=10.0, maxval=30.0)
    x2 = jnp.minimum(x1 + wh[..., 0], img_w - 1.0)
    y2 = jnp.minimum(y1 + wh[..., 1], img_h - 1.0)
    cls = jnp.ones((B, G), dtype=jnp.float32)
    gt_boxes = jnp.stack([x1, y1, x2, y2, cls], axis=2)     # (B, G, 5)
    im_info = jnp.array([[img_h, img_w, 1.0]] * B, dtype=jnp.float32)
    num_boxes = jnp.array([G] * B, dtype=jnp.int32)

    outs = layer(rpn_cls_score, gt_boxes, im_info, num_boxes)
    outs = jax.block_until_ready(outs)

    assert outs[0].shape == (B, 1, A * H, W)
    assert outs[1].shape == (B, 4 * A, H, W)
    assert outs[2].shape == (B, 4 * A, H, W)
    assert outs[3].shape == (B, 4 * A, H, W)
    assert all(bool(jnp.all(jnp.isfinite(o))) for o in outs)
    print("KERNEL_OK")
</pallas_src>

<mosaic_0001>
module attributes {stable_mosaic.version = 11 : i64} {
  func.func @_fused_kernel(%arg0: i32, %arg1: memref<8x384xf32, #tpu.memory_space<vmem>>, %arg2: memref<8x384xf32, #tpu.memory_space<vmem>>, %arg3: memref<1x5x5xf32, #tpu.memory_space<vmem>>, %arg4: memref<1x4x5xf32, #tpu.memory_space<vmem>>, %arg5: memref<5x5xf32, #tpu.memory_space<vmem>>, %arg6: memref<1x1x384xf32, #tpu.memory_space<vmem>>, %arg7: memref<1x4x384xf32, #tpu.memory_space<vmem>>) attributes {dimension_semantics = [#tpu.dimension_semantics<parallel>], iteration_bounds = array<i64: 2>, scalar_prefetch = 0 : i64, scratch_operands = 0 : i64, tpu.core_type = #tpu.core_type<tc>, window_params = [{pipeline_mode = #tpu.pipeline_mode<synchronous>, transform_indices = @transform_0, window_bounds = array<i64: 8, 384>}, {pipeline_mode = #tpu.pipeline_mode<synchronous>, transform_indices = @transform_1, window_bounds = array<i64: 8, 384>}, {transform_indices = @transform_2, window_bounds = array<i64: 1, 5, 5>}, {transform_indices = @transform_3, window_bounds = array<i64: 1, 4, 5>}, {pipeline_mode = #tpu.pipeline_mode<synchronous>, transform_indices = @transform_4, window_bounds = array<i64: 5, 5>}, {transform_indices = @transform_5, window_bounds = array<i64: 1, 1, 384>}, {transform_indices = @transform_6, window_bounds = array<i64: 1, 4, 384>}]} {
    %c0 = arith.constant 0 : index
    %c0_0 = arith.constant 0 : index
    %c0_1 = arith.constant 0 : index
    %0 = vector.load %arg3[%c0, %c0_0, %c0_1] : memref<1x5x5xf32, #tpu.memory_space<vmem>>, vector<1x5x5xf32>
    %1 = vector.shape_cast %0 : vector<1x5x5xf32> to vector<5x5xf32>
    %c0_2 = arith.constant 0 : index
    %c0_3 = arith.constant 0 : index
    %2 = vector.load %arg1[%c0_2, %c0_3] : memref<8x384xf32, #tpu.memory_space<vmem>>, vector<1x384xf32>
    %c1 = arith.constant 1 : index
    %c0_4 = arith.constant 0 : index
    %3 = vector.load %arg1[%c1, %c0_4] : memref<8x384xf32, #tpu.memory_space<vmem>>, vector<1x384xf32>
    %c2 = arith.constant 2 : index
    %c0_5 = arith.constant 0 : index
    %4 = vector.load %arg1[%c2, %c0_5] : memref<8x384xf32, #tpu.memory_space<vmem>>, vector<1x384xf32>
    %c3 = arith.constant 3 : index
    %c0_6 = arith.constant 0 : index
    %5 = vector.load %arg1[%c3, %c0_6] : memref<8x384xf32, #tpu.memory_space<vmem>>, vector<1x384xf32>
    %c4 = arith.constant 4 : index
    %c0_7 = arith.constant 0 : index
    %6 = vector.load %arg1[%c4, %c0_7] : memref<8x384xf32, #tpu.memory_space<vmem>>, vector<1x384xf32>
    %c5 = arith.constant 5 : index
    %c0_8 = arith.constant 0 : index
    %7 = vector.load %arg1[%c5, %c0_8] : memref<8x384xf32, #tpu.memory_space<vmem>>, vector<1x384xf32>
    %8 = vector.extract_strided_slice %1 {offsets = [0, 0], sizes = [5, 1], strides = [1, 1]} : vector<5x5xf32> to vector<5x1xf32>
    %9 = vector.extract_strided_slice %1 {offsets = [0, 1], sizes = [5, 1], strides = [1, 1]} : vector<5x5xf32> to vector<5x1xf32>
    %10 = vector.extract_strided_slice %1 {offsets = [0, 2], sizes = [5, 1], strides = [1, 1]} : vector<5x5xf32> to vector<5x1xf32>
    %11 = vector.extract_strided_slice %1 {offsets = [0, 3], sizes = [5, 1], strides = [1, 1]} : vector<5x5xf32> to vector<5x1xf32>
    %12 = arith.subf %10, %8 : vector<5x1xf32>
    %cst = arith.constant 1.000000e+00 : f32
    %13 = vector.broadcast %cst : f32 to vector<5x1xf32>
    %14 = arith.addf %12, %13 : vector<5x1xf32>
    %15 = arith.subf %11, %9 : vector<5x1xf32>
    %cst_9 = arith.constant 1.000000e+00 : f32
    %16 = vector.broadcast %cst_9 : f32 to vector<5x1xf32>
    %17 = arith.addf %15, %16 : vector<5x1xf32>
    %18 = arith.mulf %14, %17 : vector<5x1xf32>
    %cst_10 = arith.constant 1.000000e+00 : f32
    %19 = vector.broadcast %cst_10 : f32 to vector<5x1xf32>
    %20 = arith.cmpf oeq, %14, %19 : vector<5x1xf32>
    %cst_11 = arith.constant 1.000000e+00 : f32
    %21 = vector.broadcast %cst_11 : f32 to vector<5x1xf32>
    %22 = arith.cmpf oeq, %17, %21 : vector<5x1xf32>
    %23 = arith.andi %20, %22 : vector<5x1xi1>
    %24 = vector.broadcast %4 : vector<1x384xf32> to vector<5x384xf32>
    %25 = vector.broadcast %10 : vector<5x1xf32> to vector<5x384xf32>
    %26 = arith.minimumf %24, %25 : vector<5x384xf32>
    %27 = vector.broadcast %2 : vector<1x384xf32> to vector<5x384xf32>
    %28 = vector.broadcast %8 : vector<5x1xf32> to vector<5x384xf32>
    %29 = arith.maximumf %27, %28 : vector<5x384xf32>
    %30 = arith.subf %26, %29 : vector<5x384xf32>
    %cst_12 = arith.constant 1.000000e+00 : f32
    %31 = vector.broadcast %cst_12 : f32 to vector<5x384xf32>
    %32 = arith.addf %30, %31 : vector<5x384xf32>
    %cst_13 = arith.constant 0.000000e+00 : f32
    %33 = vector.broadcast %cst_13 : f32 to vector<5x384xf32>
    %34 = arith.maximumf %32, %33 : vector<5x384xf32>
    %35 = vector.broadcast %5 : vector<1x384xf32> to vector<5x384xf32>
    %36 = vector.broadcast %11 : vector<5x1xf32> to vector<5x384xf32>
    %37 = arith.minimumf %35, %36 : vector<5x384xf32>
    %38 = vector.broadcast %3 : vector<1x384xf32> to vector<5x384xf32>
    %39 = vector.broadcast %9 : vector<5x1xf32> to vector<5x384xf32>
    %40 = arith.maximumf %38, %39 : vector<5x384xf32>
    %41 = arith.subf %37, %40 : vector<5x384xf32>
    %cst_14 = arith.constant 1.000000e+00 : f32
    %42 = vector.broadcast %cst_14 : f32 to vector<5x384xf32>
    %43 = arith.addf %41, %42 : vector<5x384xf32>
    %cst_15 = arith.constant 0.000000e+00 : f32
    %44 = vector.broadcast %cst_15 : f32 to vector<5x384xf32>
    %45 = arith.maximumf %43, %44 : vector<5x384xf32>
    %46 = arith.mulf %34, %45 : vector<5x384xf32>
    %47 = vector.broadcast %6 : vector<1x384xf32> to vector<5x384xf32>
    %48 = vector.broadcast %18 : vector<5x1xf32> to vector<5x384xf32>
    %49 = arith.addf %47, %48 : vector<5x384xf32>
    %50 = arith.subf %49, %46 : vector<5x384xf32>
    %51 = tpu.reciprocal %50 {approx = true} : vector<5x384xf32> -> vector<5x384xf32>
    %52 = arith.mulf %46, %51 : vector<5x384xf32>
    %cst_16 = arith.constant 0.000000e+00 : f32
    %53 = vector.shape_cast %23 : vector<5x1xi1> to vector<5x1xi1>
    %54 = vector.broadcast %53 : vector<5x1xi1> to vector<5x384xi1>
    %55 = vector.broadcast %cst_16 : f32 to vector<5x384xf32>
    %56 = arith.select %54, %55, %52 : vector<5x384xi1>, vector<5x384xf32>
    %cst_17 = arith.constant 0.000000e+00 : f32
    %57 = vector.broadcast %cst_17 : f32 to vector<1x384xf32>
    %58 = arith.cmpf ogt, %7, %57 : vector<1x384xf32>
    %cst_18 = arith.constant -1.000000e+00 : f32
    %59 = vector.shape_cast %58 : vector<1x384xi1> to vector<1x384xi1>
    %60 = vector.broadcast %59 : vector<1x384xi1> to vector<5x384xi1>
    %61 = vector.broadcast %cst_18 : f32 to vector<5x384xf32>
    %62 = arith.select %60, %61, %56 : vector<5x384xi1>, vector<5x384xf32>
    %c6 = arith.constant 6 : index
    %c0_19 = arith.constant 0 : index
    %63 = vector.load %arg1[%c6, %c0_19] : memref<8x384xf32, #tpu.memory_space<vmem>>, vector<1x384xf32>
    %cst_20 = arith.constant 0.000000e+00 : f32
    %64 = vector.broadcast %cst_20 : f32 to vector<1x384xf32>
    %65 = arith.cmpf ogt, %63, %64 : vector<1x384xf32>
    %cst_21 = arith.constant -1.000000e+30 : f32
    %66 = vector.shape_cast %65 : vector<1x384xi1> to vector<1x384xi1>
    %67 = vector.broadcast %66 : vector<1x384xi1> to vector<5x384xi1>
    %68 = vector.broadcast %cst_21 : f32 to vector<5x384xf32>
    %69 = arith.select %67, %62, %68 : vector<5x384xi1>, vector<5x384xf32>
    %cst_22 = arith.constant dense<0xFF800000> : vector<5xf32>
    %70 = vector.multi_reduction <maximumf>, %69, %cst_22 [1] : vector<5x384xf32> to vector<5xf32>
    %71 = vector.shape_cast %70 : vector<5xf32> to vector<5x1xf32>
    %c0_23 = arith.constant 0 : index
    %c0_24 = arith.constant 0 : index
    %c0_25 = arith.constant 0 : index
    %72 = vector.load %arg4[%c0_23, %c0_24, %c0_25] : memref<1x4x5xf32, #tpu.memory_space<vmem>>, vector<1x4x5xf32>
    %73 = vector.shape_cast %72 : vector<1x4x5xf32> to vector<4x5xf32>
    %c0_26 = arith.constant 0 : index
    %c0_27 = arith.constant 0 : index
    %74 = vector.load %arg5[%c0_26, %c0_27] : memref<5x5xf32, #tpu.memory_space<vmem>>, vector<5x5xf32>
    %c6_28 = arith.constant 6 : index
    %c0_29 = arith.constant 0 : index
    %75 = vector.load %arg2[%c6_28, %c0_29] : memref<8x384xf32, #tpu.memory_space<vmem>>, vector<1x384xf32>
    %cst_30 = arith.constant 0.000000e+00 : f32
    %76 = vector.broadcast %cst_30 : f32 to vector<1x384xf32>
    %77 = arith.cmpf ogt, %75, %76 : vector<1x384xf32>
    %cst_31 = arith.constant 0.000000e+00 : f32
    %78 = vector.broadcast %cst_31 : f32 to vector<5x1xf32>
    %79 = arith.cmpf oeq, %71, %78 : vector<5x1xf32>
    %cst_32 = arith.constant 9.99999974E-6 : f32
    %80 = vector.broadcast %cst_32 : f32 to vector<5x1xf32>
    %81 = arith.select %79, %80, %71 : vector<5x1xi1>, vector<5x1xf32>
    %cst_33 = arith.constant dense<0xFF800000> : vector<384xf32>
    %82 = vector.multi_reduction <maximumf>, %62, %cst_33 [0] : vector<5x384xf32> to vector<384xf32>
    %83 = vector.shape_cast %82 : vector<384xf32> to vector<1x384xf32>
    %84 = vector.broadcast %81 : vector<5x1xf32> to vector<5x384xf32>
    %85 = arith.cmpf oeq, %62, %84 : vector<5x384xf32>
    %86 = arith.extui %85 : vector<5x384xi1> to vector<5x384xi32>
    %87 = arith.sitofp %86 : vector<5x384xi32> to vector<5x384xf32>
    %cst_34 = arith.constant dense<0.000000e+00> : vector<384xf32>
    %88 = vector.multi_reduction <add>, %87, %cst_34 [0] : vector<5x384xf32> to vector<384xf32>
    %89 = vector.shape_cast %88 : vector<384xf32> to vector<1x384xf32>
    %cst_35 = arith.constant -1.000000e+00 : f32
    %90 = vector.broadcast %cst_35 : f32 to vector<1x384xf32>
    %cst_36 = arith.constant 3.000000e-01 : f32
    %91 = vector.broadcast %cst_36 : f32 to vector<1x384xf32>
    %92 = arith.cmpf olt, %83, %91 : vector<1x384xf32>
    %cst_37 = arith.constant 0.000000e+00 : f32
    %93 = vector.broadcast %cst_37 : f32 to vector<1x384xf32>
    %94 = arith.select %92, %93, %90 : vector<1x384xi1>, vector<1x384xf32>
    %cst_38 = arith.constant 0.000000e+00 : f32
    %95 = vector.broadcast %cst_38 : f32 to vector<1x384xf32>
    %96 = arith.cmpf ogt, %89, %95 : vector<1x384xf32>
    %cst_39 = arith.constant 1.000000e+00 : f32
    %97 = vector.broadcast %cst_39 : f32 to vector<1x384xf32>
    %98 = arith.select %96, %97, %94 : vector<1x384xi1>, vector<1x384xf32>
    %cst_40 = arith.constant 0.699999988 : f32
    %99 = vector.broadcast %cst_40 : f32 to vector<1x384xf32>
    %100 = arith.cmpf oge, %83, %99 : vector<1x384xf32>
    %cst_41 = arith.constant 1.000000e+00 : f32
    %101 = vector.broadcast %cst_41 : f32 to vector<1x384xf32>
    %102 = arith.select %100, %101, %98 : vector<1x384xi1>, vector<1x384xf32>
    %cst_42 = arith.constant -1.000000e+00 : f32
    %103 = vector.broadcast %cst_42 : f32 to vector<1x384xf32>
    %104 = arith.select %77, %102, %103 : vector<1x384xi1>, vector<1x384xf32>
    %c0_43 = arith.constant 0 : index
    %c0_44 = arith.constant 0 : index
    %c0_45 = arith.constant 0 : index
    %105 = vector.load %arg6[%c0_43, %c0_44, %c0_45] : memref<1x1x384xf32, #tpu.memory_space<vmem>>, vector<1x1x384xf32>
    %106 = vector.shape_cast %105 : vector<1x1x384xf32> to vector<1x384xf32>
    %107 = vector.shape_cast %104 : vector<1x384xf32> to vector<1x1x384xf32>
    tpu.vector_store %arg6[%c0_43, %c0_44, %c0_45], %107 {strides = array<i32>} : memref<1x1x384xf32, #tpu.memory_space<vmem>>, vector<1x1x384xf32>,
    %108 = vector.broadcast %83 : vector<1x384xf32> to vector<5x384xf32>
    %109 = arith.cmpf oeq, %62, %108 : vector<5x384xf32>
    %110 = arith.extui %109 : vector<5x384xi1> to vector<5x384xi32>
    %111 = arith.sitofp %110 : vector<5x384xi32> to vector<5x384xf32>
    %cst_46 = arith.constant dense<0.000000e+00> : vector<5x384xf32>
    %112 = tpu.matmul %74, %111, %cst_46 {dimension_numbers = #tpu.dot_dimension_numbers<[1], [0], [0], [1], [0, 0, 1, 1], [], []>} : vector<5x5xf32>, vector<5x384xf32>, vector<5x384xf32> -> vector<5x384xf32>
    %cst_47 = arith.constant 0.000000e+00 : f32
    %113 = vector.broadcast %cst_47 : f32 to vector<5x384xf32>
    %114 = arith.cmpf ogt, %111, %113 : vector<5x384xf32>
    %cst_48 = arith.constant 5.000000e-01 : f32
    %115 = vector.broadcast %cst_48 : f32 to vector<5x384xf32>
    %116 = arith.cmpf olt, %112, %115 : vector<5x384xf32>
    %117 = arith.andi %114, %116 : vector<5x384xi1>
    %cst_49 = arith.constant 1.000000e+00 : f32
    %cst_50 = arith.constant 0.000000e+00 : f32
    %118 = vector.broadcast %cst_49 : f32 to vector<5x384xf32>
    %119 = vector.broadcast %cst_50 : f32 to vector<5x384xf32>
    %120 = arith.select %117, %118, %119 : vector<5x384xi1>, vector<5x384xf32>
    %cst_51 = arith.constant dense<0.000000e+00> : vector<4x384xf32>
    %121 = tpu.matmul %73, %120, %cst_51 {dimension_numbers = #tpu.dot_dimension_numbers<[1], [0], [0], [1], [0, 0, 1, 1], [], []>} : vector<4x5xf32>, vector<5x384xf32>, vector<4x384xf32> -> vector<4x384xf32>
    %122 = vector.extract_strided_slice %121 {offsets = [2, 0], sizes = [1, 384], strides = [1, 1]} : vector<4x384xf32> to vector<1x384xf32>
    %123 = vector.extract_strided_slice %121 {offsets = [0, 0], sizes = [1, 384], strides = [1, 1]} : vector<4x384xf32> to vector<1x384xf32>
    %124 = arith.subf %122, %123 : vector<1x384xf32>
    %cst_52 = arith.constant 1.000000e+00 : f32
    %125 = vector.broadcast %cst_52 : f32 to vector<1x384xf32>
    %126 = arith.addf %124, %125 : vector<1x384xf32>
    %127 = vector.extract_strided_slice %121 {offsets = [3, 0], sizes = [1, 384], strides = [1, 1]} : vector<4x384xf32> to vector<1x384xf32>
    %128 = vector.extract_strided_slice %121 {offsets = [1, 0], sizes = [1, 384], strides = [1, 1]} : vector<4x384xf32> to vector<1x384xf32>
    %129 = arith.subf %127, %128 : vector<1x384xf32>
    %cst_53 = arith.constant 1.000000e+00 : f32
    %130 = vector.broadcast %cst_53 : f32 to vector<1x384xf32>
    %131 = arith.addf %129, %130 : vector<1x384xf32>
    %132 = vector.extract_strided_slice %121 {offsets = [0, 0], sizes = [1, 384], strides = [1, 1]} : vector<4x384xf32> to vector<1x384xf32>
    %cst_54 = arith.constant 5.000000e-01 : f32
    %133 = vector.broadcast %cst_54 : f32 to vector<1x384xf32>
    %134 = arith.mulf %133, %126 : vector<1x384xf32>
    %135 = arith.addf %132, %134 : vector<1x384xf32>
    %136 = vector.extract_strided_slice %121 {offsets = [1, 0], sizes = [1, 384], strides = [1, 1]} : vector<4x384xf32> to vector<1x384xf32>
    %cst_55 = arith.constant 5.000000e-01 : f32
    %137 = vector.broadcast %cst_55 : f32 to vector<1x384xf32>
    %138 = arith.mulf %137, %131 : vector<1x384xf32>
    %139 = arith.addf %136, %138 : vector<1x384xf32>
    %c0_56 = arith.constant 0 : index
    %c0_57 = arith.constant 0 : index
    %140 = vector.load %arg2[%c0_56, %c0_57] : memref<8x384xf32, #tpu.memory_space<vmem>>, vector<1x384xf32>
    %141 = arith.subf %135, %140 : vector<1x384xf32>
    %c4_58 = arith.constant 4 : index
    %c0_59 = arith.constant 0 : index
    %142 = vector.load %arg2[%c4_58, %c0_59] : memref<8x384xf32, #tpu.memory_space<vmem>>, vector<1x384xf32>
    %143 = arith.mulf %141, %142 : vector<1x384xf32>
    %c1_60 = arith.constant 1 : index
    %c0_61 = arith.constant 0 : index
    %144 = vector.load %arg2[%c1_60, %c0_61] : memref<8x384xf32, #tpu.memory_space<vmem>>, vector<1x384xf32>
    %145 = arith.subf %139, %144 : vector<1x384xf32>
    %c5_62 = arith.constant 5 : index
    %c0_63 = arith.constant 0 : index
    %146 = vector.load %arg2[%c5_62, %c0_63] : memref<8x384xf32, #tpu.memory_space<vmem>>, vector<1x384xf32>
    %147 = arith.mulf %145, %146 : vector<1x384xf32>
    %148 = math.log %126 : vector<1x384xf32>
    %c2_64 = arith.constant 2 : index
    %c0_65 = arith.constant 0 : index
    %149 = vector.load %arg2[%c2_64, %c0_65] : memref<8x384xf32, #tpu.memory_space<vmem>>, vector<1x384xf32>
    %150 = arith.subf %148, %149 : vector<1x384xf32>
    %151 = math.log %131 : vector<1x384xf32>
    %c3_66 = arith.constant 3 : index
    %c0_67 = arith.constant 0 : index
    %152 = vector.load %arg2[%c3_66, %c0_67] : memref<8x384xf32, #tpu.memory_space<vmem>>, vector<1x384xf32>
    %153 = arith.subf %151, %152 : vector<1x384xf32>
    %154 = tpu.concatenate %143, %147, %150, %153 in 0 : vector<1x384xf32>, vector<1x384xf32>, vector<1x384xf32>, vector<1x384xf32> -> vector<4x384xf32>
    %cst_68 = arith.constant 0.000000e+00 : f32
    %155 = vector.shape_cast %77 : vector<1x384xi1> to vector<1x384xi1>
    %156 = vector.broadcast %155 : vector<1x384xi1> to vector<4x384xi1>
    %157 = vector.broadcast %cst_68 : f32 to vector<4x384xf32>
    %158 = arith.select %156, %154, %157 : vector<4x384xi1>, vector<4x384xf32>
    %c0_69 = arith.constant 0 : index
    %c0_70 = arith.constant 0 : index
    %c0_71 = arith.constant 0 : index
    %159 = vector.load %arg7[%c0_69, %c0_70, %c0_71] : memref<1x4x384xf32, #tpu.memory_space<vmem>>, vector<1x4x384xf32>
    %160 = vector.shape_cast %159 : vector<1x4x384xf32> to vector<4x384xf32>
    %161 = vector.shape_cast %158 : vector<4x384xf32> to vector<1x4x384xf32>
    tpu.vector_store %arg7[%c0_69, %c0_70, %c0_71], %161 {strides = array<i32>} : memref<1x4x384xf32, #tpu.memory_space<vmem>>, vector<1x4x384xf32>,
    return
  }
  func.func @transform_0(%arg0: i32) -> (i32, i32) {
    %c0_i32 = arith.constant 0 : i32
    %c0_i32_0 = arith.constant 0 : i32
    %c0_i32_1 = arith.constant 0 : i32
    return %c0_i32, %c0_i32_0 : i32, i32
  }
  func.func @transform_1(%arg0: i32) -> (i32, i32) {
    %c0_i32 = arith.constant 0 : i32
    %c0_i32_0 = arith.constant 0 : i32
    %c0_i32_1 = arith.constant 0 : i32
    return %c0_i32, %c0_i32_0 : i32, i32
  }
  func.func @transform_2(%arg0: i32) -> (i32, i32, i32) {
    %c0_i32 = arith.constant 0 : i32
    %c0_i32_0 = arith.constant 0 : i32
    %c0_i32_1 = arith.constant 0 : i32
    return %arg0, %c0_i32, %c0_i32_0 : i32, i32, i32
  }
  func.func @transform_3(%arg0: i32) -> (i32, i32, i32) {
    %c0_i32 = arith.constant 0 : i32
    %c0_i32_0 = arith.constant 0 : i32
    %c0_i32_1 = arith.constant 0 : i32
    return %arg0, %c0_i32, %c0_i32_0 : i32, i32, i32
  }
  func.func @transform_4(%arg0: i32) -> (i32, i32) {
    %c0_i32 = arith.constant 0 : i32
    %c0_i32_0 = arith.constant 0 : i32
    %c0_i32_1 = arith.constant 0 : i32
    return %c0_i32, %c0_i32_0 : i32, i32
  }
  func.func @transform_5(%arg0: i32) -> (i32, i32, i32) {
    %c0_i32 = arith.constant 0 : i32
    %c0_i32_0 = arith.constant 0 : i32
    %c0_i32_1 = arith.constant 0 : i32
    return %arg0, %c0_i32, %c0_i32_0 : i32, i32, i32
  }
  func.func @transform_6(%arg0: i32) -> (i32, i32, i32) {
    %c0_i32 = arith.constant 0 : i32
    %c0_i32_0 = arith.constant 0 : i32
    %c0_i32_1 = arith.constant 0 : i32
    return %arg0, %c0_i32, %c0_i32_0 : i32, i32, i32
  }
}

</mosaic_0001>

<bundles_post_ra>
// kernel: tpu_custom_call.1
= control target key start
LH: loop header
LB: loop body
LE: loop exit
PB: predicated region body
PF: predicated region fallthrough
CT: control target
= control target key end

     0   :  { %12 = vsyncpa [#allocation3], 0  ;;  %s1993_s0 = inlined_call_operand.vmem [shape: f32[8,384], index: 0, kind: input, shape index: {}]   ;;  %s1994_s1 = inlined_call_operand.hbm [shape: f32[8,384], index: 1, kind: input, shape index: {}]   ;;  %s1995_s2 = inlined_call_operand.vmem [shape: f32[2,5,5], index: 2, kind: input, shape index: {}]   ;;  %s1996_s3 = inlined_call_operand.vmem [shape: f32[2,4,5], index: 3, kind: input, shape index: {}]   ;;  %s1997_s4 = inlined_call_operand.vmem [shape: f32[5,5], index: 4, kind: input, shape index: {}]   ;;  %s1998_s5 = inlined_call_operand.hbm [shape: f32[2,1,384], index: 5, kind: output, shape index: {0}]   ;;  %s1999_s6 = inlined_call_operand.hbm [shape: f32[2,4,384], index: 6, kind: output, shape index: {1}]  }
   0x1   :  { %13 = vsyncpa [#allocation4], 0 }
   0x2   :  { %15 = vsyncpa [#allocation4 + $0x1], 0 }
   0x3   :  { %16 = vsyncpa [#allocation7], 0 }
   0x4   :  { %18 = vsyncpa [#allocation7 + $0x1], 0  ;;  %s1616_s21 = smov 0   ;;  %s1618_s22 = smov 0  }
   0x5   :  { %s1620_s23 = smov 0   ;;  %s1622_s24 = smov 0  }
   0x6 LB: > { %s1637_s25 = sadd.s32 4294967295, %s1566_s24   ;;  %s1305_s26 = sadd.s32 4294967294, %s1566_s24   ;;  %s1566_s24 = sphi %s1622_s24, %s2025_s24   ;;  %s1562_s23 = sphi %s1620_s23, %s2024_s23   ;;  %s1558_s22 = sphi %s1618_s22, %s2023_s22   ;;  %s1554_s21 = sphi %s1616_s21, %s2022_s21  }
   0x7   : > { %s1641_s27 = sadd.s32 1, %s1566_s24   ;;  %s146_s28 = sadd.s32 1, %s1562_s23 }
   0x8   : > { %s143_s29 = ssub.s32 %s1566_s24, %s1641_s27  ;;  %p156_p0 = scmp.ne.s32.totalorder %s1562_s23, %s1558_s22 }
   0x9   : > { %p144_p1 = scmp.eq.s32.totalorder %s143_s29, 0  ;;  %p157_p2 = scmp.eq.s32.totalorder %s1637_s25, 1 }
   0xa   : > { %p162_p3 = scmp.ne.s32.totalorder %s1558_s22, %s1554_s21  ;;  %p163_p4 = scmp.eq.s32.totalorder %s1305_s26, 1 }
   0xb   : > { %s1652_s30 = scalar_select %p144_p1, %s1562_s23, %s146_s28  }
   0xc   : > { %p1654_p5 = por %p157_p2, %p156_p0  ;;  %p1658_p6 = por %p163_p4, %p162_p3 }
   0xd   : > { %p1306_p7 = scmp.ge.s32.totalorder %s1566_s24, 1  ;;  %p196_p8 = scmp.lt.s32.totalorder %s1566_s24, 3 }
   0xe   : > { %s2003_s7 = scalar_select %p1654_p5, 1, 0 }
   0xf   : > { %s2004_s8 = scalar_select %p1658_p6, 1, 0 }
  0x10   : > { %p2000_p9 = scmp.eq.s32.totalorder %s1637_s25, 0  ;;  %p1665_p10 = pnand %p1306_p7, %p196_p8 }
  0x11   : > { %s1568_s10 = smov [#allocation2]   ;;  %s1440_s15 = scalar_lea.hbm %s1994_s1, 384 }
  0x12   : > { %s2005_s9 = scalar_select %p1665_p10, 1, 0 }
  0x13   : > { %s212_s11 = sshll.u32 %s1568_s10, 4  ;;  %p1365_p11 = pneg %p1665_p10  ;;  %s213_s11 = int_to_ptr.vmem [resolvable:$true] %s212_s11 }
  0x14   : > { %p1441_p13 = scmp.ne.s32.totalorder %s1994_s1, %s1440_s15  ;;  %p1447_p3 = scmp.lt.u32.totalorder %s1440_s15, %s1994_s1 }
  0x15   : > { %p1673_p12 = pnand %p2000_p9, %p1365_p11 }
  0x17   : > { %p1442_p0 = pneg %p1673_p12 }
  0x19   : > { %p1443_p1 = pnand %p1442_p0, %p1441_p13 }
  0x1b   : > { %p1444_p2 = pneg %p1443_p1 }
  0x1d   : > { %p1449_p4 = pnand %p1447_p3, %p1444_p2 }
  0x1f   : > { %1452 = shalt.err (!%p1449_p4)
}
  0x20   : > { %s1453_s20 = scalar_lea.vmem %s213_s11, 384  ;;  %p1461_p9 = scmp.lt.s32.totalorder %s213_s11, %s213_s11 }
  0x21   : > { %p1454_p7 = scmp.ne.s32.totalorder %s213_s11, %s1453_s20  ;;  %p1462_p6 = scmp.lt.s32.totalorder %s1453_s20, %s1453_s20 }
  0x23   : > { %p1456_p8 = pnand %p1454_p7, %p1442_p0  ;;  %p1463_p5 = por %p1462_p6, %p1461_p9 }
  0x25   : > { %p1457_p11 = pneg %p1456_p8 }
  0x27   : > { %p1464_p10 = pnand %p1463_p5, %p1457_p11 }
  0x29   : > { %1467 = shalt.err (!%p1464_p10)
}
  0x2a   : > { %1368 = dma.hbm_to_vmem [thread:$0]  (!%p1673_p12), %s1994_s1, 384, %s213_s11, [#allocation3]  }
  0x2b   : > { %p2007_p13 = scmp.ne.s32.totalorder %s2005_s9, 0 }
  0x2c   : > { %p2008_p1 = scmp.eq.s32.totalorder (!%p2007_p13), %s1637_s25, 0 }
  0x2d   : > { %242 = sbr.rel (%p2007_p13) target bundleno = 933 (0x3a5), region = 40 }
  0x34   : > { %1541 = dma.done.wait (%p2008_p1), [#allocation3], 384   ;;  %p2009_p0 = pmov %p2008_p1 }
  0x35   : > { %p280_p6 = scmp.lt.s32.totalorder %s1637_s25, 1  ;;  %v1569_v0 = vmov 0   ;;  %v1570_v1 = vmov 2   ;;  %s1571_s13 = smov 2   ;;  %v1573_v7 = vmov 3   ;;  %v1574_v8 = vmov 1  }
  0x36   : > { %1543 = vsyncadd (%p2009_p0), [#allocation3], 4294966912  ;;  %1423 = vset.pattern.permute.xlu0 %v1569_v0  ;;  %1422 = vset.pattern.permute.xlu1 %v1570_v1  ;;  %s1572_s14 = smov 127   ;;  %v1575_v13 = vmov 0.0   ;;  %vm1576_vm3 = vmmov 0   ;;  %v318_v14 = vlaneseq  ;;  %vm513_vm7 = vcmask 1044480  }
  0x37   : > { %s1702_s29 = scalar_select %p280_p6, %s1637_s25, 1  ;;  %1343 = vmatprep.subr.mxu1 %v1575_v13  ;;  %716 = vmatprep.mubr.f32.mxu0 %v1575_v13  ;;  %v1314_v17 = vld [vmem:[%s1993_s0 + $0x2] ss:$8 sm:$0x7] }
  0x38   : > { %1345 = vmatprep.mubr.msk.f32.mxu1 %vm1576_vm3, %v1575_v13  ;;  %v1717_v16 = vshrl.u32 %v318_v14, 7  ;;  %v289_v22 = vld [vmem:[%s1993_s0] ss:$8 sm:$0x7]  ;;  %s1843_s17 = sand.u32 1, %s1558_s22   ;;  %p2016_p9 = scmp.ne.s32.totalorder %s2003_s7, 0 }
  0x39   : > { %s1311_s10 = sshll.u32 %s1702_s29, 3  ;;  %v1315_v23 = vld [vmem:[%s1993_s0 + $0x3] ss:$8 sm:$0x7]  ;;  %s1353_s18 = smul.u32 3, %s1843_s17 }
  0x3a   : > { %s283_s12 = scalar_lea.vmem %s1995_s2, %s1311_s10  ;;  %v1723_v18 = vsub.s32 0, %v1717_v16  ;;  %v1726_v19 = vsub.s32 1, %v1717_v16  ;;  %v1729_v21 = vsub.s32 2, %v1717_v16  ;;  %v1313_v24 = vld [vmem:[%s1993_s0 + $0x1] ss:$8 sm:$0x7] }
  0x3b   : > { %v288_v2 = vld [vmem:[%s283_s12] sm:$0x1f]  ;;  %s1852_s19 = scalar_lea.vmem [#allocation5], %s1353_s18  ;;  %s1312_s20 = sshll.u32 %s1702_s29, 2 }
  0x3c   : > { %301 = vrot.lane.b32.xlu0 %v288_v2, %s1571_s13  ;;  %v321_v25 = vrot.slane %v1314_v17, %v1723_v18  ;;  %v325_v26 = vrot.slane %v1314_v17, %v1726_v19  ;;  %v344_v27 = vrot.slane %v289_v22, %v1723_v18  ;;  %v348_v28 = vrot.slane %v289_v22, %v1726_v19  ;;  %v1316_v57 = vld [vmem:[%s1993_s0 + $0x4] ss:$8 sm:$0x7]  ;;  %s287_s10 = scalar_lea.vmem %s1996_s3, %s1312_s20  ;;  %s1355_s29 = smul.u32 48, %s1637_s25 }
  0x3d   : > { %v376_v29 = vrot.slane %v1315_v23, %v1723_v18  ;;  %v380_v30 = vrot.slane %v1315_v23, %v1726_v19  ;;  %v399_v32 = vrot.slane %v1313_v24, %v1723_v18  ;;  %v403_v33 = vrot.slane %v1313_v24, %v1726_v19  ;;  %s1176_s9 = sshll.u32 %s1852_s19, 4  ;;  %s1579_s16 = smov [#allocation5]   ;;  %s1177_s9 = int_to_ptr.vmem [resolvable:$true] %s1176_s9 }
  0x3e   : > { %v329_v34 = vrot.slane %v1314_v17, %v1729_v21  ;;  %v384_v35 = vrot.slane %v1315_v23, %v1729_v21  ;;  %v352_v36 = vrot.slane %v289_v22, %v1729_v21  ;;  %v407_v37 = vrot.slane %v1313_v24, %v1729_v21  ;;  %s1875_s13 = scalar_lea.hbm %s1998_s5, %s1355_s29  ;;  %s1468_s15 = scalar_lea.vmem %s1177_s9, 48 }
  0x3f   : > { %p1469_p5 = scmp.ne.s32.totalorder %s1177_s9, %s1468_s15  ;;  %s1472_s18 = sshll.u32 %s1579_s16, 4  ;;  %s1473_s18 = int_to_ptr.vmem [resolvable:$false] %s1472_s18 }
  0x40   : > { %s1474_s20 = scalar_lea.vmem %s1473_s18, 96  ;;  %p1475_p2 = scmp.lt.s32.totalorder %s1177_s9, %s1473_s18 }
  0x41   : > { %p1470_p10 = pnand %p1469_p5, %p2016_p9  ;;  %p1476_p3 = scmp.lt.s32.totalorder %s1474_s20, %s1468_s15 }
  0x43   : > { %p1471_p12 = pneg %p1470_p10  ;;  %p1477_p4 = por %p1476_p3, %p1475_p2 }
  0x45   : > { %p1478_p7 = pnand %p1477_p4, %p1471_p12 }
  0xae   : > { %v302_v3 = vpop.permute.xlu0 %301 }
  0xaf   : > { %v304_v4 = vsub.f32 %v288_v2, %v302_v3 }
  0xb1   : > { %v305_v5 = vadd.f32 1.0, %v304_v4 }
  0xb3   : > { %307 = vrot.lane.b32.xlu0 %v305_v5, %s1572_s14  ;;  %vm311_vm0 = vcmp.eq.f32.partialorder %v305_v5, 1.0 }
  0xb4   : > { %v312_v6 = vsel %vm311_vm0, 1, %v1569_v0 }
  0xb5   : > { %313 = vrot.lane.b32.xlu1 %v312_v6, %s1572_s14  ;;  %s1157_s14 = scalar_lea.sflag [#allocation4], %s1843_s17 }
  0xb7   : > { %357 = vperm.xlu0 %1423, %v288_v2  }
  0xb9   : > { %334 = vperm.xlu1 %1422, %v288_v2  }
  0xbb   : > { %1426 = vset.pattern.permute.xlu0 %v1570_v1 }
  0xbd   : > { %1424 = vset.pattern.permute.xlu1 %v1573_v7 }
  0xbe   : > { %389 = vperm.xlu1 %1424, %v288_v2  }
  0xc2   : > { %1425 = vset.pattern.permute.xlu1 %v1574_v8  ;;  %v438_v8 = vrot.slane %v1316_v57, %v1726_v19 }
  0xc3   : > { %412 = vperm.xlu1 %1425, %v288_v2  }
  0xc7   : > { %1427 = vset.pattern.permute.xlu1 %v1570_v1  ;;  %v434_v1 = vrot.slane %v1316_v57, %v1723_v18 }
 0x125   : > { %v308_v9 = vpop.permute.xlu0 %307 }
 0x126   : > { %v310_v10 = vmul.f32 %v308_v9, %v305_v5  ;;  %v442_v9 = vrot.slane %v1316_v57, %v1729_v21 }
 0x127   : > { %v314_v11 = vpop.permute.xlu1 %313 }
 0x128   : > { %vm315_vm1 = vcmp.ne.s32.totalorder %v314_v11, 0  ;;  %448 = vperm.xlu0 %1426, %v310_v10  }
 0x129   : > { %vm316_vm2 = vmand %vm311_vm0, %vm315_vm1  ;;  %vm639_vm0 = vcmask 39936  }
 0x12a   : > { %v463_v12 = vsel %vm316_vm2, 1, %v1569_v0 }
 0x12b   : > { %465 = vperm.xlu1 %1427, %v463_v12  }
 0x136   : > { %v358_v31 = vpop.permute.xlu0 %357 }
 0x137   : > { %v360_v41 = vmax.f32 %v344_v27, %v358_v31  ;;  %v361_v42 = vmax.f32 %v348_v28, %v358_v31  ;;  %v362_v49 = vmax.f32 %v352_v36, %v358_v31  ;;  %v1318_v27 = vld [vmem:[%s1993_s0 + $0x6] ss:$8 sm:$0x7] }
 0x138   : > { %v335_v15 = vpop.permute.xlu1 %334  ;;  %vm493_vm5 = vcmp.gt.f32.partialorder %v1318_v27, 0.0 }
 0x139   : > { %v337_v39 = vmin.f32 %v321_v25, %v335_v15  ;;  %v338_v40 = vmin.f32 %v325_v26, %v335_v15  ;;  %v339_v47 = vmin.f32 %v329_v34, %v335_v15  ;;  %v1317_v26 = vld [vmem:[%s1993_s0 + $0x5] ss:$8 sm:$0x7] }
 0x13a   : > { %vm471_vm4 = vcmp.gt.f32.partialorder %v1317_v26, 0.0  ;;  %v522_v26 = vld [vmem:[%s1997_s4] sm:$0x1f] }
 0x13b   : > { %v363_v51 = vsub.f32 %v337_v39, %v360_v41  ;;  %v364_v52 = vsub.f32 %v338_v40, %v361_v42  ;;  %v365_v55 = vsub.f32 %v339_v47, %v362_v49  ;;  %v472_v28 = vsel %vm471_vm4, 1, %v1569_v0 }
 0x13c   : > { %v480_v31 = vrot.slane %v472_v28, %v1726_v19 }
 0x13d   : > { %v390_v20 = vpop.permute.xlu1 %389  ;;  %v366_v58 = vadd.f32 1.0, %v363_v51  ;;  %v367_v59 = vadd.f32 1.0, %v364_v52  ;;  %v368_v62 = vadd.f32 1.0, %v365_v55 }
 0x13e   : > { %v392_v43 = vmin.f32 %v376_v29, %v390_v20  ;;  %v393_v44 = vmin.f32 %v380_v30, %v390_v20  ;;  %v394_v48 = vmin.f32 %v384_v35, %v390_v20  ;;  %v494_v29 = vsel %vm493_vm5, 1, %v1569_v0 }
 0x13f   : > { %v369_v2 = vmax.f32 %v366_v58, 0.0  ;;  %v370_v3 = vmax.f32 %v367_v59, 0.0  ;;  %v371_v6 = vmax.f32 %v368_v62, 0.0  ;;  %v476_v30 = vrot.slane %v472_v28, %v1723_v18 }
 0x140   : > { %v502_v35 = vrot.slane %v494_v29, %v1726_v19  ;;  %vm486_vm8 = vcmp.eq.s32.totalorder %v480_v31, 1 }
 0x141   : > { %vm485_vm6 = vcmp.eq.s32.totalorder %v476_v30, 1 }
 0x142   : > { %v413_v38 = vpop.permute.xlu1 %412  ;;  %vm1776_vm12 = vcmp.eq.s32.totalorder %v502_v35, 1 }
 0x143   : > { %v415_v45 = vmax.f32 %v399_v32, %v413_v38  ;;  %v416_v46 = vmax.f32 %v403_v33, %v413_v38  ;;  %v417_v50 = vmax.f32 %v407_v37, %v413_v38  ;;  %v498_v32 = vrot.slane %v494_v29, %v1723_v18 }
 0x144   : > { %v484_v33 = vrot.slane %v472_v28, %v1729_v21  ;;  %v506_v37 = vrot.slane %v494_v29, %v1729_v21 }
 0x145   : > { %v418_v53 = vsub.f32 %v392_v43, %v415_v45  ;;  %v419_v54 = vsub.f32 %v393_v44, %v416_v46  ;;  %v420_v56 = vsub.f32 %v394_v48, %v417_v50  ;;  %vm1772_vm10 = vcmp.eq.s32.totalorder %v498_v32, 1 }
 0x146   : > { %vm487_vm11 = vcmp.eq.s32.totalorder %v484_v33, 1  ;;  %vm1780_vm13 = vcmp.eq.s32.totalorder %v506_v37, 1 }
 0x147   : > { %v421_v60 = vadd.f32 1.0, %v418_v53  ;;  %v422_v61 = vadd.f32 1.0, %v419_v54  ;;  %v423_v63 = vadd.f32 1.0, %v420_v56 }
 0x149   : > { %v424_v4 = vmax.f32 %v421_v60, 0.0  ;;  %v425_v5 = vmax.f32 %v422_v61, 0.0  ;;  %v426_v7 = vmax.f32 %v423_v63, 0.0 }
 0x14b   : > { %v427_v11 = vmul.f32 %v424_v4, %v369_v2  ;;  %v428_v12 = vmul.f32 %v425_v5, %v370_v3  ;;  %v429_v15 = vmul.f32 %v426_v7, %v371_v6 }
 0x1a7   : > { %v449_v10 = vpop.permute.xlu0 %448 }
 0x1a8   : > { %v451_v17 = vadd.f32 %v449_v10, %v434_v1  ;;  %v452_v20 = vadd.f32 %v449_v10, %v438_v8  ;;  %v453_v22 = vadd.f32 %v449_v10, %v442_v9 }
 0x1aa   : > { %v454_v23 = vsub.f32 %v451_v17, %v427_v11  ;;  %v455_v24 = vsub.f32 %v452_v20, %v428_v12  ;;  %v456_v25 = vsub.f32 %v453_v22, %v429_v15  ;;  %v466_v34 = vpop.permute.xlu1 %465 }
 0x1ab   : > { %vm467_vm9 = vcmp.eq.s32.totalorder %v466_v34, 1 }
 0x1ac   : > { %1428 = vrcp.f32 %v454_v23 }
 0x1ad   : > { %1430 = vrcp.f32 %v455_v24 }
 0x1ae   : > { %1432 = vrcp.f32 %v456_v25 }
 0x1b6   : > { %v1429_v36 = vpop.eup %1428 }
 0x1b7   : > { %v1431_v38 = vpop.eup %1430  ;;  %v460_v39 = vmul.f32 %v1429_v36, %v427_v11 }
 0x1b8   : > { %v1433_v40 = vpop.eup %1432  ;;  %v461_v41 = vmul.f32 %v1431_v38, %v428_v12 }
 0x1b9   : > { %v462_v43 = vmul.f32 %v1433_v40, %v429_v15  ;;  %v468_v44 = vsel %vm467_vm9, 0.0, %v460_v39  ;;  %v1577_v39 = vmov 1966171168  }
 0x1ba   : > { %v469_v46 = vsel %vm467_vm9, 0.0, %v461_v41  ;;  %v488_v47 = vsel %vm485_vm6, -1.0, %v468_v44  ;;  %v602_v40 = vunpack.c.l.s4 %v1577_v39 }
 0x1bb   : > { %v470_v49 = vsel %vm467_vm9, 0.0, %v462_v43  ;;  %v489_v50 = vsel %vm486_vm8, -1.0, %v469_v46  ;;  %v528_v51 = vsel %vm513_vm7, %v488_v47, -inf  ;;  %v510_v52 = vsel %vm1772_vm10, %v488_v47, -1e+30 }
 0x1bc   : > { %v490_v53 = vsel %vm487_vm11, -1.0, %v470_v49  ;;  %v529_v54 = vrot.slane %v528_v51, 4  ;;  %v535_v55 = vsel %vm513_vm7, %v489_v50, -inf  ;;  %v511_v56 = vsel %vm1776_vm12, %v489_v50, -1e+30 }
 0x1bd   : > { %v536_v57 = vrot.slane %v535_v55, 4  ;;  %v542_v58 = vsel %vm513_vm7, %v490_v53, -inf  ;;  %v512_v59 = vsel %vm1780_vm13, %v490_v53, -1e+30  ;;  %v514_v60 = vsel %vm513_vm7, %v510_v52, -inf }
 0x1be   : > { %v530_v61 = vmax.f32 %v528_v51, %v529_v54  ;;  %v543_v62 = vrot.slane %v542_v58, 4  ;;  %v515_v63 = vsel %vm513_vm7, %v511_v56, -inf  ;;  %v516_v5 = vsel %vm513_vm7, %v512_v59, -inf }
 0x1bf   : > { %v537_v1 = vmax.f32 %v535_v55, %v536_v57  ;;  %v517_v2 = vmax.f32 %v514_v60, %v515_v63 }
 0x1c0   : > { %v531_v3 = vrot.slane %v530_v61, 2  ;;  %v544_v4 = vmax.f32 %v542_v58, %v543_v62  ;;  %v1578_v58 = vmov -1.0  }
 0x1c1   : > { %v518_v6 = vmax.f32 %v517_v2, %v516_v5  ;;  %v538_v7 = vrot.slane %v537_v1, 2 }
 0x1c2   : > { %v545_v8 = vrot.slane %v544_v4, 2  ;;  %v532_v9 = vmax.f32 %v530_v61, %v531_v3 }
 0x1c3   : > { %519 = vmax.xlane.f32.xlu1 %v518_v6  ;;  %v539_v10 = vmax.f32 %v537_v1, %v538_v7  ;;  %v1846_v7 = vld [vmem:[#allocation2 + $0x6] ss:$8 sm:$0x7] }
 0x1c4   : > { %v546_v11 = vmax.f32 %v544_v4, %v545_v8  ;;  %v533_v12 = vrot.slane %v532_v9, 1 }
 0x1c5   : > { %v540_v15 = vrot.slane %v539_v10, 1 }
 0x1c6   : > { %v547_v17 = vrot.slane %v546_v11, 1  ;;  %v1796_v20 = vmax.f32 %v532_v9, %v533_v12 }
 0x1c7   : > { %v1798_v22 = vmax.f32 %v539_v10, %v540_v15 }
 0x1c8   : > { %v1800_v23 = vmax.f32 %v546_v11, %v547_v17  ;;  %vm630_vm14 = vcmp.eq.f32.partialorder %v488_v47, %v1796_v20  ;;  %vm591_vm11 = vcmp.ge.f32.partialorder %v1796_v20, 0.7  ;;  %v521_v17 = vld [vmem:[%s287_s10] sm:$0xf] }
 0x1c9   : > { %vm631_vm15 = vcmp.eq.f32.partialorder %v489_v50, %v1798_v22  ;;  %v1805_v24 = vsel %vm630_vm14, 1.0, %v1575_v13  ;;  %vm580_vm8 = vcmp.lt.f32.partialorder %v1798_v22, 0.3  ;;  %vm592_vm10 = vcmp.ge.f32.partialorder %v1798_v22, 0.7 }
 0x1ca   : > { %v1808_v25 = vsel %vm631_vm15, 1.0, %v1575_v13  ;;  %vm632_vm1 = vcmp.eq.f32.partialorder %v490_v53, %v1800_v23  ;;  %vm581_vm9 = vcmp.lt.f32.partialorder %v1800_v23, 0.3  ;;  %v583_v59 = vsel %vm580_vm8, 0.0, %v1578_v58 }
 0x1cb   : > { %1325 = vmatprep.subr.msk.mxu0 %vm513_vm7, %v1808_v25  ;;  %v1817_v27 = vsel %vm632_vm1, 1.0, %v1575_v13  ;;  %v584_v61 = vsel %vm581_vm9, 0.0, %v1578_v58  ;;  %vm593_vm15 = vcmp.ge.f32.partialorder %v1800_v23, 0.7  ;;  %vm525_vm1 = vcmp.gt.f32.partialorder %v1846_v7, 0.0 }
 0x1cc   : > { %1326 = vmatpush1.msk.msra.mxu0 %vm513_vm7, %v1805_v24  ;;  %1344 = vmatpush3.msk.msra.mxu1 %vm513_vm7, %v1817_v27 }
 0x1cd   : > { %1327 = vmatmul.mubr.msk.f32.vlgmr.msra.gmra.mrb[0].mxu0 %vm639_vm0, %v522_v26  ;;  %1346 = vmatmul.mubr.msk.f32.vlgmr.msra.gmra.mrb[0].mxu1 %vm639_vm0, %v522_v26 }
 0x1ce   : > { %1348 = vmatprep.subr.mxu1 %v1575_v13  ;;  %1350 = vmatprep.mubr.msk.f32.mxu1 %vm1576_vm3, %v1575_v13  ;;  %vm579_vm3 = vcmp.lt.f32.partialorder %v1796_v20, 0.3 }
 0x1cf   : > { %881 = vmatprep.mubr.f32.mxu0 %v1575_v13  ;;  %v582_v60 = vsel %vm579_vm3, 0.0, %v1578_v58 }
 0x250   : > { %v520_v28 = vpop.xlane.xlu1 %519 }
 0x251   : > { %vm526_vm2 = vcmp.eq.f32.partialorder %v520_v28, 0.0 }
 0x252   : > { %v527_v29 = vsel %vm526_vm2, 1e-05, %v520_v28  ;;  %vm627_vm2 = vcmp.lt.s32.totalorder %v318_v14, 384 }
 0x253   : > { %vm549_vm4 = vcmp.eq.f32.partialorder %v488_v47, %v527_v29  ;;  %vm550_vm5 = vcmp.eq.f32.partialorder %v489_v50, %v527_v29  ;;  %vm551_vm6 = vcmp.eq.f32.partialorder %v490_v53, %v527_v29  ;;  %v603_v47 = vunpack.c.0.s8 %v602_v40 }
 0x254   : > { %v1319_v30 = vsel %vm549_vm4, 1.0, %v1575_v13  ;;  %v1320_v31 = vsel %vm550_vm5, 1.0, %v1575_v13  ;;  %v1321_v32 = vsel %vm551_vm6, 1.0, %v1575_v13  ;;  %vm793_vm4 = vcmp.gt.f32.partialorder %v1805_v24, 0.0 }
 0x255   : > { %v558_v33 = vsel %vm513_vm7, %v1319_v30, 0.0  ;;  %v565_v34 = vsel %vm513_vm7, %v1320_v31, 0.0  ;;  %v572_v35 = vsel %vm513_vm7, %v1321_v32, 0.0  ;;  %v606_v54 = vsub.s32 %v603_v47, %v1717_v16 }
 0x256   : > { %v559_v36 = vrot.slane %v558_v33, 4  ;;  %v566_v37 = vrot.slane %v565_v34, 4  ;;  %v573_v38 = vrot.slane %v572_v35, 4  ;;  %vm795_vm6 = vcmp.gt.f32.partialorder %v1817_v27, 0.0 }
 0x258   : > { %v560_v41 = vadd.f32 %v559_v36, %v558_v33  ;;  %v567_v42 = vadd.f32 %v566_v37, %v565_v34  ;;  %v574_v43 = vadd.f32 %v573_v38, %v572_v35 }
 0x25a   : > { %v561_v44 = vrot.slane %v560_v41, 2  ;;  %v568_v45 = vrot.slane %v567_v42, 2  ;;  %v575_v46 = vrot.slane %v574_v43, 2 }
 0x25c   : > { %v562_v48 = vadd.f32 %v561_v44, %v560_v41  ;;  %v569_v49 = vadd.f32 %v568_v45, %v567_v42  ;;  %v576_v50 = vadd.f32 %v575_v46, %v574_v43 }
 0x25e   : > { %v563_v51 = vrot.slane %v562_v48, 1  ;;  %v570_v52 = vrot.slane %v569_v49, 1  ;;  %v577_v53 = vrot.slane %v576_v50, 1 }
 0x260   : > { %v564_v55 = vadd.f32 %v563_v51, %v562_v48  ;;  %v571_v56 = vadd.f32 %v570_v52, %v569_v49  ;;  %v578_v57 = vadd.f32 %v577_v53, %v576_v50 }
 0x262   : > { %vm585_vm12 = vcmp.gt.f32.partialorder %v564_v55, 0.0  ;;  %vm586_vm13 = vcmp.gt.f32.partialorder %v571_v56, 0.0  ;;  %vm587_vm14 = vcmp.gt.f32.partialorder %v578_v57, 0.0 }
 0x263   : > { %v588_v62 = vsel %vm585_vm12, 1.0, %v582_v60  ;;  %v589_v63 = vsel %vm586_vm13, 1.0, %v583_v59  ;;  %v590_v16 = vsel %vm587_vm14, 1.0, %v584_v61 }
 0x264   : > { %v594_v1 = vsel %vm591_vm11, 1.0, %v588_v62  ;;  %v595_v2 = vsel %vm592_vm10, 1.0, %v589_v63  ;;  %v596_v3 = vsel %vm593_vm15, 1.0, %v590_v16  ;;  %vm794_vm10 = vcmp.gt.f32.partialorder %v1808_v25, 0.0 }
 0x265   : > { %v600_v4 = vcombine.low %v594_v1, %v595_v2  ;;  %v614_v6 = vrot.slane %v596_v3, %v606_v54 }
 0x267   : > { %v607_v5 = vrot.slane %v600_v4, %v606_v54 }
 0x269   : > { %v615_v8 = vcombine.low %v607_v5, %v614_v6 }
 0x26b   : > { %v622_v9 = vrot.slane %v615_v8, %v606_v54 }
 0x26d   : > { %v624_v10 = vsel %vm525_vm1, %v622_v9, -1.0 }
 0x26e   : > { %629 = vst.msk [vmem:[%s1852_s19] sm:$0x7] %vm627_vm2, %v624_v10 }
 0x2a0   : > { %v718_v11 = vpop.f32.mrb[0].mxu0  ;;  %v789_v12 = vpop.f32.mrb[0].mxu1 }
 0x2a1   : > { %vm796_vm5 = vcmp.lt.f32.partialorder %v718_v11, 0.5  ;;  %v720_v15 = vpop.f32.mrb[1].mxu0  ;;  %vm798_vm3 = vcmp.lt.f32.partialorder %v789_v12, 0.5  ;;  %v1347_v14 = vpop.f32.mrb[1].mxu1 }
 0x2a2   : > { %vm799_vm8 = vmand %vm793_vm4, %vm796_vm5  ;;  %vm797_vm9 = vcmp.lt.f32.partialorder %v720_v15, 0.5 }
 0x2a3   : > { %vm801_vm11 = vmand %vm795_vm6, %vm798_vm3  ;;  %v802_v23 = vsel %vm799_vm8, 1.0, %v1575_v13 }
 0x2a4   : > { %v804_v20 = vsel %vm801_vm11, 1.0, %v1575_v13  ;;  %vm800_vm12 = vmand %vm794_vm10, %vm797_vm9 }
 0x2a5   : > { %v803_v22 = vsel %vm800_vm12, 1.0, %v1575_v13  ;;  %1349 = vmatpush3.msk.msra.mxu1 %vm513_vm7, %v804_v20 }
 0x2a6   : > { %1351 = vmatmul.mubr.msk.f32.vlgmr.msra.gmra.mrb[2].mxu1 %vm639_vm0, %v521_v17  ;;  %1330 = vmatprep.subr.msk.mxu0 %vm513_vm7, %v803_v22 }
 0x2a7   : > { %1331 = vmatpush1.msk.msra.mxu0 %vm513_vm7, %v802_v23 }
 0x2a8   : > { %1332 = vmatmul.mubr.msk.f32.vlgmr.msra.gmra.mrb[2].mxu0 %vm639_vm0, %v521_v17 }
 0x2a9   : > { %1481 = shalt.err (!%p1478_p7)
}
 0x2aa   : > { %s1482_s19 = scalar_lea.hbm %s1875_s13, 48  ;;  %s1486_s10 = scalar_lea.hbm %s1998_s5, 96 }
 0x2ab   : > { %p1483_p8 = scmp.ne.s32.totalorder %s1875_s13, %s1482_s19  ;;  %p1487_p1 = scmp.lt.u32.totalorder %s1875_s13, %s1998_s5 }
 0x2ac   : > { %p1488_p0 = scmp.lt.u32.totalorder %s1486_s10, %s1482_s19  ;;  %p1490_p5 = scmp.lt.u32.totalorder %s1482_s19, %s1875_s13 }
 0x2ad   : > { %p1484_p11 = pnand %p1483_p8, %p2016_p9 }
 0x2ae   : > { %p1489_p6 = por %p1488_p0, %p1487_p1 }
 0x2af   : > { %p1485_p13 = pneg %p1484_p11 }
 0x2b0   : > { %p1491_p10 = por %p1490_p5, %p1489_p6 }
 0x2b2   : > { %p1492_p12 = pnand %p1491_p10, %p1485_p13 }
 0x2b4   : > { %1495 = shalt.err (!%p1492_p12)
}
 0x2b5   : > { %1361 = dma.vmem_to_hbm [thread:$0]  (%p2016_p9), %s1177_s9, 48, %s1875_s13, %s1157_s14   ;;  %v988_v28 = vld [vmem:[#allocation2] ss:$8 sm:$0x7]  ;;  %vm1119_vm7 = vcmask 1040384   ;;  %v1131_v2 = vsel %vm525_vm1, 1, %v1569_v0 }
 0x2b6   : > { %v1030_v31 = vld [vmem:[#allocation2 + $0x1] ss:$8 sm:$0x7]  ;;  %v1009_v34 = vld [vmem:[#allocation2 + $0x4] ss:$8 sm:$0x7]  ;;  %v1001_v40 = vrot.slane %v988_v28, %v1729_v21  ;;  %v993_v47 = vrot.slane %v988_v28, %v1723_v18  ;;  %v997_v53 = vrot.slane %v988_v28, %v1726_v19  ;;  %v1143_v7 = vrot.slane %v1131_v2, %v1729_v21 }
 0x2b7   : > { %v1895_v36 = vld [vmem:[#allocation2 + $0x5] ss:$8 sm:$0x7]  ;;  %v1022_v41 = vrot.slane %v1009_v34, %v1729_v21  ;;  %v1043_v42 = vrot.slane %v1030_v31, %v1729_v21  ;;  %v1035_v48 = vrot.slane %v1030_v31, %v1723_v18  ;;  %v1078_v51 = vld [vmem:[#allocation2 + $0x2] ss:$8 sm:$0x7]  ;;  %v1039_v54 = vrot.slane %v1030_v31, %v1726_v19 }
 0x2b8   : > { %v1064_v45 = vrot.slane %v1895_v36, %v1729_v21  ;;  %v1099_v55 = vld [vmem:[#allocation2 + $0x3] ss:$8 sm:$0x7]  ;;  %v1014_v56 = vrot.slane %v1009_v34, %v1723_v18  ;;  %v1056_v57 = vrot.slane %v1895_v36, %v1723_v18  ;;  %v1018_v62 = vrot.slane %v1009_v34, %v1726_v19  ;;  %s1354_s9 = smul.u32 12, %s1843_s17  ;;  %s1580_s19 = smov [#allocation6]  }
 0x2b9   : > { %v1091_v63 = vrot.slane %v1078_v51, %v1729_v21  ;;  %v1060_v1 = vrot.slane %v1895_v36, %v1726_v19  ;;  %v1112_v3 = vrot.slane %v1099_v55, %v1729_v21  ;;  %v1083_v6 = vrot.slane %v1078_v51, %v1723_v18  ;;  %s1356_s12 = smul.u32 192, %s1637_s25  ;;  %s1162_s25 = scalar_lea.sflag [#allocation7], %s1843_s17 }
 0x2ba   : > { %v1104_v8 = vrot.slane %v1099_v55, %v1723_v18  ;;  %vm1123_vm0 = vcmask 1041408   ;;  %v1087_v14 = vrot.slane %v1078_v51, %v1726_v19  ;;  %v1108_v17 = vrot.slane %v1099_v55, %v1726_v19  ;;  %s279_s13 = scalar_lea.vmem [#allocation6], %s1354_s9  ;;  %s1500_s26 = sshll.u32 %s1580_s19, 4  ;;  %s1501_s26 = int_to_ptr.vmem [resolvable:$false] %s1500_s26 }
 0x2bb   : > { %vm1127_vm13 = vcmask 1042432   ;;  %v1135_v20 = vrot.slane %v1131_v2, %v1723_v18  ;;  %vm1926_vm14 = vcmp.eq.s32.totalorder %v1143_v7, 1  ;;  %s1190_s14 = sshll.u32 %s279_s13, 4  ;;  %s1950_s18 = scalar_lea.hbm %s1999_s6, %s1356_s12  ;;  %s1952_s14 = int_to_ptr.vmem [resolvable:$true] %s1190_s14 }
 0x2bc   : > { %s1496_s20 = scalar_lea.vmem %s1952_s14, 192  ;;  %s1502_s28 = scalar_lea.vmem %s1501_s26, 384 }
 0x2bd   : > { %vm1930_vm15 = vcmp.eq.s32.totalorder %v1135_v20, 1  ;;  %p1497_p2 = scmp.ne.s32.totalorder %s1952_s14, %s1496_s20  ;;  %p1503_p7 = scmp.lt.s32.totalorder %s1952_s14, %s1501_s26 }
 0x2be   : > { %p1504_p8 = scmp.lt.s32.totalorder %s1502_s28, %s1496_s20 }
 0x2bf   : > { %p1498_p3 = pnand %p1497_p2, %p2016_p9 }
 0x2c0   : > { %p1505_p11 = por %p1504_p8, %p1503_p7 }
 0x2c1   : > { %p1499_p4 = pneg %p1498_p3 }
 0x2c3   : > { %p1506_p13 = pnand %p1505_p11, %p1499_p4 }
 0x379   : > { %v954_v13 = vpop.f32.mrb[2].mxu1 }
 0x37a   : > { %v963_v24 = vrot.slane %v954_v13, 6  ;;  %v1352_v25 = vpop.f32.mrb[3].mxu1 }
 0x37b   : > { %v883_v26 = vpop.f32.mrb[2].mxu0  ;;  %v1139_v25 = vrot.slane %v1131_v2, %v1726_v19 }
 0x37c   : > { %v969_v27 = vsub.f32 %v954_v13, %v963_v24  ;;  %v961_v29 = vrot.slane %v883_v26, 6  ;;  %v885_v30 = vpop.f32.mrb[3].mxu0 }
 0x37d   : > { %v962_v32 = vrot.slane %v885_v30, 6  ;;  %vm1145_vm1 = vcmp.eq.s32.totalorder %v1139_v25, 1 }
 0x37e   : > { %v972_v33 = vadd.f32 1.0, %v969_v27  ;;  %v967_v35 = vsub.f32 %v883_v26, %v961_v29 }
 0x37f   : > { %v968_v37 = vsub.f32 %v885_v30, %v962_v32 }
 0x380   : > { %v975_v38 = vmul.f32 0.5, %v972_v33  ;;  %1434 = vlog2.f32 %v972_v33  ;;  %v970_v39 = vadd.f32 1.0, %v967_v35 }
 0x381   : > { %v971_v43 = vadd.f32 1.0, %v968_v37 }
 0x382   : > { %v981_v44 = vrot.slane %v975_v38, 2  ;;  %v973_v46 = vmul.f32 0.5, %v970_v39  ;;  %1436 = vlog2.f32 %v970_v39 }
 0x383   : > { %v974_v49 = vmul.f32 0.5, %v971_v43  ;;  %1438 = vlog2.f32 %v971_v43 }
 0x384   : > { %v987_v50 = vadd.f32 %v981_v44, %v954_v13  ;;  %v979_v52 = vrot.slane %v973_v46, 2 }
 0x385   : > { %v980_v58 = vrot.slane %v974_v49, 2 }
 0x386   : > { %v1007_v59 = vsub.f32 %v987_v50, %v1001_v40  ;;  %v1049_v60 = vsub.f32 %v987_v50, %v1043_v42  ;;  %v985_v61 = vadd.f32 %v979_v52, %v883_v26 }
 0x387   : > { %v986_v16 = vadd.f32 %v980_v58, %v885_v30 }
 0x388   : > { %v1005_v4 = vsub.f32 %v985_v61, %v993_v47  ;;  %v1047_v5 = vsub.f32 %v985_v61, %v1035_v48  ;;  %v1028_v12 = vmul.f32 %v1022_v41, %v1007_v59  ;;  %v1070_v15 = vmul.f32 %v1064_v45, %v1049_v60 }
 0x389   : > { %v1006_v9 = vsub.f32 %v986_v16, %v997_v53  ;;  %v1048_v10 = vsub.f32 %v986_v16, %v1039_v54 }
 0x38a   : > { %v1435_v11 = vpop.eup %1434  ;;  %v1026_v23 = vmul.f32 %v1014_v56, %v1005_v4  ;;  %v1068_v13 = vmul.f32 %v1056_v57, %v1047_v5  ;;  %v1122_v21 = vsel %vm1119_vm7, %v1028_v12, %v1070_v15 }
 0x38b   : > { %v1076_v0 = vmul.f32 0.6931472, %v1435_v11  ;;  %v1027_v24 = vmul.f32 %v1018_v62, %v1006_v9  ;;  %v1069_v30 = vmul.f32 %v1060_v1, %v1048_v10 }
 0x38c   : > { %v1437_v22 = vpop.eup %1436  ;;  %v1120_v35 = vsel %vm1119_vm7, %v1026_v23, %v1068_v13 }
 0x38d   : > { %v1439_v26 = vpop.eup %1438  ;;  %v1097_v27 = vsub.f32 %v1076_v0, %v1091_v63  ;;  %v1118_v28 = vsub.f32 %v1076_v0, %v1112_v3  ;;  %v1072_v29 = vmul.f32 0.6931472, %v1437_v22  ;;  %v1121_v40 = vsel %vm1119_vm7, %v1027_v24, %v1069_v30 }
 0x38e   : > { %v1074_v31 = vmul.f32 0.6931472, %v1439_v26 }
 0x38f   : > { %v1095_v18 = vsub.f32 %v1072_v29, %v1083_v6  ;;  %v1116_v33 = vsub.f32 %v1072_v29, %v1104_v8  ;;  %v1126_v19 = vsel %vm1123_vm0, %v1122_v21, %v1097_v27 }
 0x390   : > { %v1096_v36 = vsub.f32 %v1074_v31, %v1087_v14  ;;  %v1117_v37 = vsub.f32 %v1074_v31, %v1108_v17  ;;  %v1130_v38 = vsel %vm1127_vm13, %v1126_v19, %v1118_v28 }
 0x391   : > { %v1124_v39 = vsel %vm1123_vm0, %v1120_v35, %v1095_v18  ;;  %v1149_v41 = vsel %vm1926_vm14, %v1130_v38, 0.0 }
 0x392   : > { %v1125_v42 = vsel %vm1123_vm0, %v1121_v40, %v1096_v36  ;;  %v1128_v43 = vsel %vm1127_vm13, %v1124_v39, %v1116_v33  ;;  %1155 = vst [vmem:[%s279_s13 + $0x8] sm:$0xf] %v1149_v41 }
 0x393   : > { %v1129_v44 = vsel %vm1127_vm13, %v1125_v42, %v1117_v37  ;;  %v1147_v45 = vsel %vm1930_vm15, %v1128_v43, 0.0 }
 0x394   : > { %v1148_v46 = vsel %vm1145_vm1, %v1129_v44, 0.0 }
 0x395   : > { %v1152_v47 = vcombine.low %v1147_v45, %v1148_v46 }
 0x397   : > { %1154 = vst [vmem:[%s279_s13] sm:$0xff] %v1152_v47 }
 0x398   : > { %1509 = shalt.err (!%p1506_p13)
}
 0x399   : > { %s1510_s17 = scalar_lea.hbm %s1950_s18, 192  ;;  %s1514_s11 = scalar_lea.hbm %s1999_s6, 384 }
 0x39a   : > { %p1511_p1 = scmp.ne.s32.totalorder %s1950_s18, %s1510_s17  ;;  %p1515_p5 = scmp.lt.u32.totalorder %s1950_s18, %s1999_s6 }
 0x39b   : > { %p1516_p10 = scmp.lt.u32.totalorder %s1514_s11, %s1510_s17  ;;  %p1518_p2 = scmp.lt.u32.totalorder %s1510_s17, %s1950_s18 }
 0x39c   : > { %p1512_p0 = pnand %p1511_p1, %p2016_p9 }
 0x39d   : > { %p1517_p12 = por %p1516_p10, %p1515_p5 }
 0x39e   : > { %p1513_p6 = pneg %p1512_p0 }
 0x39f   : > { %p1519_p3 = por %p1518_p2, %p1517_p12 }
 0x3a1   : > { %p1520_p4 = pnand %p1519_p3, %p1513_p6 }
 0x3a3   : > { %1523 = shalt.err (!%p1520_p4)
}
 0x3a4   : > { %1362 = dma.vmem_to_hbm [thread:$0]  (%p2016_p9), %s1952_s14, 192, %s1950_s18, %s1162_s25  }
 0x3a5 PF: > { %p1378_p7 = scmp.ge.s32.totalorder %s1566_s24, 2  ;;  %s1202_s13 = sand.u32 1, %s1554_s21  }
 0x3a6   : > { %p2021_p8 = scmp.ne.s32.totalorder %s2004_s8, 0  ;;  %s1203_s15 = scalar_lea.sflag [#allocation4], %s1202_s13 }
 0x3a8   : > { %p1370_p11 = pnand %p1378_p7, %p2021_p8 }
 0x3aa   : > { %1545 = dma.done.wait (!%p1370_p11), %s1203_s15, 48  }
 0x3ab   : > { %1547 = vsyncadd (!%p1370_p11), %s1203_s15, 4294967248  ;;  %s1212_s16 = scalar_lea.sflag [#allocation7], %s1202_s13 }
 0x3ac   : > { %1549 = dma.done.wait (!%p1370_p11), %s1212_s16, 192  }
 0x3ad   : > { %1551 = vsyncadd (!%p1370_p11), %s1212_s16, 4294967104  ;;  %p21_p9 = scmp.ge.s32.totalorder %s1641_s27, 4   ;;  %s2022_s21 = smov %s1558_s22 }
 0x3ae   : > { %s2023_s22 = smov %s1562_s23  ;;  %s2024_s23 = smov %s1652_s30 }
 0x3af   : > { %s2025_s24 = smov %s1641_s27  ;;  %23 = sbr.rel (!%p21_p9) target bundleno = 6 (0x6), region = 112 }
 0x3b6   :  { %1217 = vsyncpa [#allocation3], 1 }
 0x3b7   :  { %1219 = vsyncpa [#allocation3 + $0x1], 1 }
 0x3b8   :  { %1220 = vsyncpa [#allocation4], 1 }
 0x3b9   :  { %1222 = vsyncpa [#allocation4 + $0x1], 1 }
 0x3ba   :  { %1223 = vsyncpa [#allocation7], 1 }
 0x3bb   :  { %1225 = vsyncpa [#allocation7 + $0x1], 1 }

</bundles_post_ra>
